<compile_context>
chip_gen: v5e
topology: v5e:2x2
jax: 0.10.0
libtpu: 0.0.40
codegen_flags: <defaults>
</compile_context>

<pallas_src>
import functools
import math

import jax
import jax.numpy as jnp
import numpy as np
from jax.experimental import pallas as pl
from jax.experimental.pallas import tpu as pltpu


def _round_up(v, m):
    return ((v + m - 1) // m) * m


def _lcm(a, b):
    return a * b // math.gcd(a, b)


def _lsigf_kernel(x_ref, s_ref, h_ref, b_ref, y_ref, z_ref, *, E, K, BtG):
    """Graph filter for one batch block.

    x_ref: (Bt*G, Np)          input block (compute dtype), rows = (batch, g)
    s_ref: (E, Np, Np)         graph shift operators (resident, compute dtype)
    h_ref: (Bt*F, E*K*Bt*G)    block-diagonal expanded taps (resident)
    b_ref: (Bt*F, 1)           bias per output row (f32), broadcasts over nodes
    y_ref: (Bt*F, Np)          output block, rows = (batch, f)
    z_ref: (E*K*Bt*G, Np)      VMEM scratch holding all diffused powers
    """
    x0 = x_ref[...]                                            # (Bt*G, Np), bf16

    # E and K are tiny & static -> unrolled.  Each diffusion step is one MXU
    # matmul on a batch-blocked (Bt*G, Np) slab.  The LHS of each step is read
    # straight from the just-written Z slab: the power is cast to the compute
    # dtype exactly once and never carried in (f32) vregs.
    for e in range(E):
        z_ref[pl.ds(e * K * BtG, BtG), :] = x0                 # S^0 x
        s_e = s_ref[e]                                         # (Np, Np)
        for k in range(1, K):
            prev = z_ref[pl.ds((e * K + k - 1) * BtG, BtG), :]
            xk = jnp.dot(prev, s_e, preferred_element_type=jnp.float32)
            z_ref[pl.ds((e * K + k) * BtG, BtG), :] = xk.astype(z_ref.dtype)

    # Single fused tap-mix matmul over the stacked powers (deep contraction),
    # replacing E*K tiny (F, G)-contraction matmuls.
    acc = jnp.dot(h_ref[...], z_ref[...],
                  preferred_element_type=jnp.float32)          # (Bt*F, Np)
    acc = acc + b_ref[...]                                     # (Bt*F, 1) broadcast
    y_ref[...] = acc.astype(y_ref.dtype)


def _choose_block_batch(B, G, F, K, Np, sub_x, sub_y, block_batch):
    """Pick Bt: MXU-friendly diffusion M, bounded tap-mix waste, megacore split."""
    # Hard alignment: BtG multiple of sub_x, BtF multiple of sub_y (sublane tiles).
    align = _lcm(sub_x // math.gcd(sub_x, G), sub_y // math.gcd(sub_y, F))
    if block_batch is None:
        target = pl.cdiv(128, G)                     # diffusion rows BtG >= 128
        if K > 1:
            # Block-diagonal tap-mix waste <= ~25% of diffusion flops:
            #   F*K*Bt / ((K-1)*Np) <= 1/4
            waste_cap = max(1, (Np * (K - 1)) // (4 * F * K))
        else:
            waste_cap = target
        two_core = pl.cdiv(B, 2) if B > 1 else 1     # keep >=2 blocks for megacore
        bt = max(1, min(target, waste_cap, two_core))
    else:
        bt = max(1, int(block_batch))
    bt = _round_up(bt, align)
    if bt >= B:
        bt = B    # single block == full array extents (always a legal block shape)
    return bt


def graph_filter_forward(x, S, weight, bias=None, *, block_batch=None,
                         compute_dtype=jnp.bfloat16,
                         single_buffer_constants=True):
    """LSIGF forward: x (B,G,N), S (E,N,N), weight (F,E,K,G), bias (F,1) -> (B,F,N)."""
    B, G, N = x.shape
    F, E, K, G2 = weight.shape
    assert G2 == G
    assert S.shape == (E, N, N)
    if bias is None:
        bias = jnp.zeros((F, 1), jnp.float32)
    assert bias.shape == (F, 1)

    cd_size = np.dtype(compute_dtype).itemsize
    out_size = np.dtype(x.dtype).itemsize
    sub_x = max(8, 32 // cd_size)    # sublane tile of the x block (16 for bf16)
    sub_y = max(8, 32 // out_size)   # sublane tile of the y block (8 for f32)

    # Lane-dense node axis.  Moderate graphs align to 256 so every MXU output /
    # contraction tile on v6e/v7x (2x256x256) is full; tiny graphs keep 128.
    lane_align = 256 if N > 128 else 128
    Np = _round_up(N, lane_align)

    # Batch blocking.
    Bt = _choose_block_batch(B, G, F, K, Np, sub_x, sub_y, block_batch)
    Bp = _round_up(B, Bt)
    n_blocks = Bp // Bt
    BtG, BtF, EKBtG = Bt * G, Bt * F, E * K * Bt * G

    # Wrapper-side layout: cast x to the compute dtype (numerically identical,
    # the kernel stores bf16(x) into Z either way) and pad batch / nodes.
    x_p = jnp.pad(x, ((0, Bp - B), (0, 0), (0, Np - N))).astype(compute_dtype)
    x2 = x_p.reshape(Bp * G, Np)                               # rows = (batch, g)
    S_p = jnp.pad(S, ((0, 0), (0, Np - N), (0, Np - N))).astype(compute_dtype)

    # Block-diagonal expansion of the taps so the whole tap-mix for a batch
    # block is a single matmul: H[(b,f), (e,k,c,g)] = h[f,e,k,g] * (b == c).
    eye = jnp.eye(Bt, dtype=weight.dtype)
    h_all = jnp.einsum('fekg,bc->bfekcg', weight, eye)
    h_all = h_all.reshape(BtF, EKBtG).astype(compute_dtype)

    bias_blk = jnp.tile(bias.astype(jnp.float32), (Bt, 1))     # (Bt*F, 1)

    kernel = functools.partial(_lsigf_kernel, E=E, K=K, BtG=BtG)

    # Advisory cost estimate for XLA scheduling around the custom call.
    flops = (2 * n_blocks * E * max(K - 1, 0) * BtG * Np * Np  # diffusion
             + 2 * n_blocks * BtF * EKBtG * Np)                # fused tap-mix
    bytes_accessed = int(x2.size * x2.dtype.itemsize
                         + S_p.size * S_p.dtype.itemsize
                         + h_all.size * h_all.dtype.itemsize
                         + bias_blk.size * 4
                         + Bp * F * Np * out_size)
    cost = pl.CostEstimate(flops=int(flops), transcendentals=0,
                           bytes_accessed=bytes_accessed)

    # VMEM budget.  x / y blocks are double-buffered by the pipeline; the
    # constant-index-map operands (S, taps, bias) are single-buffered when
    # pl.Buffered(1) is in effect.  The cap is generation-aware: ~40 MiB on
    # v7x (64 MiB/TC physical) and ~104 MiB on v5e/v6e (128 MiB physical).
    n_cb = 1 if single_buffer_constants else 2
    vmem_need = (2 * BtG * Np * cd_size                        # x block
                 + 2 * BtF * Np * out_size                     # y block
                 + n_cb * E * Np * Np * cd_size                # S (resident)
                 + n_cb * BtF * EKBtG * cd_size                # taps (resident)
                 + n_cb * BtF * 128 * 4                        # bias (lane padded)
                 + EKBtG * Np * cd_size)                       # Z scratch
    margin = 2 * 1024 * 1024
    try:
        phys = int(pltpu.get_tpu_info().vmem_capacity_bytes)
    except Exception:
        phys = 64 * 1024 * 1024
    cap = max(phys - 24 * 1024 * 1024, phys // 2)
    if vmem_need + margin > cap:
        # TODO(synk): add a streaming-S path (memory_space=pl.ANY + manually
        # double-buffered column tiles of S) for graphs whose GSO exceeds VMEM.
        raise ValueError(
            f"GraphFilter resident VMEM footprint {vmem_need / 2**20:.1f} MiB "
            f"exceeds the {cap / 2**20:.0f} MiB budget on this TPU generation; "
            "reduce block_batch / node count or add an S-streaming path.")
    vmem_limit = int(min(max(vmem_need + margin, 32 * 1024 * 1024), cap))

    def _const_spec(shape, index_map):
        # Constants fetched once don't need a second pipeline buffer.
        if single_buffer_constants:
            return pl.BlockSpec(shape, index_map, pipeline_mode=pl.Buffered(1))
        return pl.BlockSpec(shape, index_map)

    y2 = pl.pallas_call(
        kernel,
        out_shape=jax.ShapeDtypeStruct((Bp * F, Np), x.dtype),
        grid=(n_blocks,),
        in_specs=[
            pl.BlockSpec((BtG, Np), lambda i: (i, 0)),          # x: one batch block
            _const_spec((E, Np, Np), lambda i: (0, 0, 0)),      # S: full, resident
            _const_spec((BtF, EKBtG), lambda i: (0, 0)),        # taps: full, resident
            _const_spec((BtF, 1), lambda i: (0, 0)),            # bias: full, resident
        ],
        out_specs=pl.BlockSpec((BtF, Np), lambda i: (i, 0)),
        scratch_shapes=[pltpu.VMEM((EKBtG, Np), compute_dtype)],
        compiler_params=pltpu.CompilerParams(
            dimension_semantics=("parallel",),
            vmem_limit_bytes=vmem_limit,
        ),
        cost_estimate=cost,
    )(x2, S_p, h_all, bias_blk)

    return y2.reshape(Bp, F, Np)[:B, :, :N]
    # TODO(synk): the temporal LSIGFT branch (T > 0) of GraphFilter is not
    # implemented; only the standard (non-temporal) LSIGF forward is covered.


def _lsigf_reference(weight, S, x, bias, compute_dtype=jnp.float32):
    """Pure-JAX reference mirroring the PyTorch LSIGF.

    `compute_dtype` casts the matmul operands (like the kernel does) while
    keeping f32 accumulation.
    """
    F, E, K, G = weight.shape
    B, _, N = x.shape
    cd = compute_dtype
    xk = jnp.broadcast_to(x[:, None].astype(jnp.float32), (B, E, G, N))
    zs = [xk]
    for _ in range(1, K):
        xk = jnp.einsum('begn,enm->begm', xk.astype(cd), S.astype(cd),
                        preferred_element_type=jnp.float32)
        zs.append(xk)
    z = jnp.stack(zs, axis=2)                                  # (B, E, K, G, N)
    y = jnp.einsum('bekgn,fekg->bfn', z.astype(cd), weight.astype(cd),
                   preferred_element_type=jnp.float32)
    if bias is not None:
        y = y + bias.astype(jnp.float32)[None]
    return y.astype(x.dtype)


if __name__ == "__main__":
    # Small, module-consistent shapes: batch=8, in_features G=4, out_features
    # F=6, filter_taps K=3, edge_features E=1, nodes N=16.
    B, G, F, K, E, N = 8, 4, 6, 3, 1, 16

    key = jax.random.PRNGKey(0)
    kx, ks, kw, kb = jax.random.split(key, 4)

    # Deterministic parameter init matching reset_parameters: U(-stdv, stdv).
    stdv = 1.0 / (G * K) ** 0.5
    weight = jax.random.uniform(kw, (F, E, K, G), jnp.float32, -stdv, stdv)
    bias = jax.random.uniform(kb, (F, 1), jnp.float32, -stdv, stdv)

    # Example inputs: a random GSO (addGSO) and random graph signals.
    S = jax.random.normal(ks, (E, N, N), jnp.float32) / jnp.sqrt(N)
    x = jax.random.normal(kx, (B, G, N), jnp.float32)

    def run(single_buffer_constants):
        fwd = jax.jit(functools.partial(
            graph_filter_forward,
            single_buffer_constants=single_buffer_constants))
        return jax.block_until_ready(fwd(x, S, weight, bias))

    try:
        y = run(True)
    except Exception:
        # Fallback if this JAX build rejects pl.Buffered(1) single-buffering
        # of the constant-index-map operands.
        y = run(False)
    assert y.shape == (B, F, N)

    # Tight check vs a reference that mirrors the kernel's bf16 matmul operands.
    y_ref_bf16 = jax.block_until_ready(
        _lsigf_reference(weight, S, x, bias, compute_dtype=jnp.bfloat16))
    assert jnp.allclose(y, y_ref_bf16, atol=1e-2, rtol=1e-2), \
        "mismatch vs bf16-mirrored reference"

    # Looser sanity check vs the full-precision reference.
    y_ref_f32 = jax.block_until_ready(
        _lsigf_reference(weight, S, x, bias, compute_dtype=jnp.float32))
    assert jnp.allclose(y, y_ref_f32, atol=5e-2, rtol=5e-2), \
        "mismatch vs f32 reference"

    print("KERNEL_OK")
</pallas_src>

<mosaic_0001>
module attributes {stable_mosaic.version = 11 : i64} {
  func.func @_lsigf_kernel(%arg0: i32, %arg1: memref<16x128xbf16, #tpu.memory_space<vmem>>, %arg2: memref<1x128x128xbf16, #tpu.memory_space<vmem>>, %arg3: memref<24x48xbf16, #tpu.memory_space<vmem>>, %arg4: memref<24x1xf32, #tpu.memory_space<vmem>>, %arg5: memref<24x128xf32, #tpu.memory_space<vmem>>, %arg6: memref<48x128xbf16, #tpu.memory_space<vmem>>) attributes {dimension_semantics = [#tpu.dimension_semantics<parallel>], iteration_bounds = array<i64: 2>, scalar_prefetch = 0 : i64, scratch_operands = 1 : i64, tpu.core_type = #tpu.core_type<tc>, window_params = [{transform_indices = @transform_0, window_bounds = array<i64: 16, 128>}, {pipeline_mode = #tpu.pipeline_mode<synchronous>, transform_indices = @transform_1, window_bounds = array<i64: 1, 128, 128>}, {pipeline_mode = #tpu.pipeline_mode<synchronous>, transform_indices = @transform_2, window_bounds = array<i64: 24, 48>}, {pipeline_mode = #tpu.pipeline_mode<synchronous>, transform_indices = @transform_3, window_bounds = array<i64: 24, 1>}, {transform_indices = @transform_4, window_bounds = array<i64: 24, 128>}]} {
    %c0 = arith.constant 0 : index
    %c0_0 = arith.constant 0 : index
    %0 = vector.load %arg1[%c0, %c0_0] : memref<16x128xbf16, #tpu.memory_space<vmem>>, vector<16x128xbf16>
    %c0_1 = arith.constant 0 : index
    %c0_2 = arith.constant 0 : index
    %1 = vector.load %arg6[%c0_1, %c0_2] : memref<48x128xbf16, #tpu.memory_space<vmem>>, vector<16x128xbf16>
    tpu.vector_store %arg6[%c0_1, %c0_2], %0 {strides = array<i32>} : memref<48x128xbf16, #tpu.memory_space<vmem>>, vector<16x128xbf16>,
    %c0_3 = arith.constant 0 : index
    %c0_4 = arith.constant 0 : index
    %c0_5 = arith.constant 0 : index
    %2 = vector.load %arg2[%c0_3, %c0_4, %c0_5] : memref<1x128x128xbf16, #tpu.memory_space<vmem>>, vector<1x128x128xbf16>
    %3 = vector.shape_cast %2 : vector<1x128x128xbf16> to vector<128x128xbf16>
    %c0_6 = arith.constant 0 : index
    %c0_7 = arith.constant 0 : index
    %4 = vector.load %arg6[%c0_6, %c0_7] : memref<48x128xbf16, #tpu.memory_space<vmem>>, vector<16x128xbf16>
    %cst = arith.constant dense<0.000000e+00> : vector<16x128xf32>
    %5 = tpu.matmul %4, %3, %cst {dimension_numbers = #tpu.dot_dimension_numbers<[1], [0], [0], [1], [0, 0, 1, 1], [], []>} : vector<16x128xbf16>, vector<128x128xbf16>, vector<16x128xf32> -> vector<16x128xf32>
    %6 = arith.truncf %5 : vector<16x128xf32> to vector<16x128xbf16>
    %c16 = arith.constant 16 : index
    %c0_8 = arith.constant 0 : index
    %7 = vector.load %arg6[%c16, %c0_8] : memref<48x128xbf16, #tpu.memory_space<vmem>>, vector<16x128xbf16>
    tpu.vector_store %arg6[%c16, %c0_8], %6 {strides = array<i32>} : memref<48x128xbf16, #tpu.memory_space<vmem>>, vector<16x128xbf16>,
    %c16_9 = arith.constant 16 : index
    %c0_10 = arith.constant 0 : index
    %8 = vector.load %arg6[%c16_9, %c0_10] : memref<48x128xbf16, #tpu.memory_space<vmem>>, vector<16x128xbf16>
    %cst_11 = arith.constant dense<0.000000e+00> : vector<16x128xf32>
    %9 = tpu.matmul %8, %3, %cst_11 {dimension_numbers = #tpu.dot_dimension_numbers<[1], [0], [0], [1], [0, 0, 1, 1], [], []>} : vector<16x128xbf16>, vector<128x128xbf16>, vector<16x128xf32> -> vector<16x128xf32>
    %10 = arith.truncf %9 : vector<16x128xf32> to vector<16x128xbf16>
    %c32 = arith.constant 32 : index
    %c0_12 = arith.constant 0 : index
    %11 = vector.load %arg6[%c32, %c0_12] : memref<48x128xbf16, #tpu.memory_space<vmem>>, vector<16x128xbf16>
    tpu.vector_store %arg6[%c32, %c0_12], %10 {strides = array<i32>} : memref<48x128xbf16, #tpu.memory_space<vmem>>, vector<16x128xbf16>,
    %c0_13 = arith.constant 0 : index
    %c0_14 = arith.constant 0 : index
    %12 = vector.load %arg3[%c0_13, %c0_14] : memref<24x48xbf16, #tpu.memory_space<vmem>>, vector<24x48xbf16>
    %c0_15 = arith.constant 0 : index
    %c0_16 = arith.constant 0 : index
    %13 = vector.load %arg6[%c0_15, %c0_16] : memref<48x128xbf16, #tpu.memory_space<vmem>>, vector<48x128xbf16>
    %cst_17 = arith.constant dense<0.000000e+00> : vector<24x128xf32>
    %14 = tpu.matmul %12, %13, %cst_17 {dimension_numbers = #tpu.dot_dimension_numbers<[1], [0], [0], [1], [0, 0, 1, 1], [], []>} : vector<24x48xbf16>, vector<48x128xbf16>, vector<24x128xf32> -> vector<24x128xf32>
    %c0_18 = arith.constant 0 : index
    %c0_19 = arith.constant 0 : index
    %15 = vector.load %arg4[%c0_18, %c0_19] : memref<24x1xf32, #tpu.memory_space<vmem>>, vector<24x1xf32>
    %16 = vector.broadcast %15 : vector<24x1xf32> to vector<24x128xf32>
    %17 = arith.addf %14, %16 : vector<24x128xf32>
    %c0_20 = arith.constant 0 : index
    %c0_21 = arith.constant 0 : index
    %18 = vector.load %arg5[%c0_20, %c0_21] : memref<24x128xf32, #tpu.memory_space<vmem>>, vector<24x128xf32>
    tpu.vector_store %arg5[%c0_20, %c0_21], %17 {strides = array<i32>} : memref<24x128xf32, #tpu.memory_space<vmem>>, vector<24x128xf32>,
    return
  }
  func.func @transform_0(%arg0: i32) -> (i32, i32) {
    %c0_i32 = arith.constant 0 : i32
    %c0_i32_0 = arith.constant 0 : i32
    return %arg0, %c0_i32 : i32, i32
  }
  func.func @transform_1(%arg0: i32) -> (i32, i32, i32) {
    %c0_i32 = arith.constant 0 : i32
    %c0_i32_0 = arith.constant 0 : i32
    %c0_i32_1 = arith.constant 0 : i32
    %c0_i32_2 = arith.constant 0 : i32
    return %c0_i32, %c0_i32_0, %c0_i32_1 : i32, i32, i32
  }
  func.func @transform_2(%arg0: i32) -> (i32, i32) {
    %c0_i32 = arith.constant 0 : i32
    %c0_i32_0 = arith.constant 0 : i32
    %c0_i32_1 = arith.constant 0 : i32
    return %c0_i32, %c0_i32_0 : i32, i32
  }
  func.func @transform_3(%arg0: i32) -> (i32, i32) {
    %c0_i32 = arith.constant 0 : i32
    %c0_i32_0 = arith.constant 0 : i32
    %c0_i32_1 = arith.constant 0 : i32
    return %c0_i32, %c0_i32_0 : i32, i32
  }
  func.func @transform_4(%arg0: i32) -> (i32, i32) {
    %c0_i32 = arith.constant 0 : i32
    %c0_i32_0 = arith.constant 0 : i32
    return %arg0, %c0_i32 : i32, i32
  }
}

module attributes {stable_mosaic.version = 11 : i64} {
  func.func @_lsigf_kernel(%arg0: i32, %arg1: memref<16x128xbf16, #tpu.memory_space<vmem>>, %arg2: memref<1x128x128xbf16, #tpu.memory_space<vmem>>, %arg3: memref<24x48xbf16, #tpu.memory_space<vmem>>, %arg4: memref<24x1xf32, #tpu.memory_space<vmem>>, %arg5: memref<24x128xf32, #tpu.memory_space<vmem>>, %arg6: memref<48x128xbf16, #tpu.memory_space<vmem>>) attributes {dimension_semantics = [#tpu.dimension_semantics<parallel>], iteration_bounds = array<i64: 2>, scalar_prefetch = 0 : i64, scratch_operands = 1 : i64, tpu.core_type = #tpu.core_type<tc>, window_params = [{transform_indices = @transform_0, window_bounds = array<i64: 16, 128>}, {pipeline_mode = #tpu.pipeline_mode<synchronous>, transform_indices = @transform_1, window_bounds = array<i64: 1, 128, 128>}, {pipeline_mode = #tpu.pipeline_mode<synchronous>, transform_indices = @transform_2, window_bounds = array<i64: 24, 48>}, {pipeline_mode = #tpu.pipeline_mode<synchronous>, transform_indices = @transform_3, window_bounds = array<i64: 24, 1>}, {transform_indices = @transform_4, window_bounds = array<i64: 24, 128>}]} {
    %c0 = arith.constant 0 : index
    %c0_0 = arith.constant 0 : index
    %0 = vector.load %arg1[%c0, %c0_0] : memref<16x128xbf16, #tpu.memory_space<vmem>>, vector<16x128xbf16>
    %c0_1 = arith.constant 0 : index
    %c0_2 = arith.constant 0 : index
    %1 = vector.load %arg6[%c0_1, %c0_2] : memref<48x128xbf16, #tpu.memory_space<vmem>>, vector<16x128xbf16>
    tpu.vector_store %arg6[%c0_1, %c0_2], %0 {strides = array<i32>} : memref<48x128xbf16, #tpu.memory_space<vmem>>, vector<16x128xbf16>,
    %c0_3 = arith.constant 0 : index
    %c0_4 = arith.constant 0 : index
    %c0_5 = arith.constant 0 : index
    %2 = vector.load %arg2[%c0_3, %c0_4, %c0_5] : memref<1x128x128xbf16, #tpu.memory_space<vmem>>, vector<1x128x128xbf16>
    %3 = vector.shape_cast %2 : vector<1x128x128xbf16> to vector<128x128xbf16>
    %c0_6 = arith.constant 0 : index
    %c0_7 = arith.constant 0 : index
    %4 = vector.load %arg6[%c0_6, %c0_7] : memref<48x128xbf16, #tpu.memory_space<vmem>>, vector<16x128xbf16>
    %cst = arith.constant dense<0.000000e+00> : vector<16x128xf32>
    %5 = tpu.matmul %4, %3, %cst {dimension_numbers = #tpu.dot_dimension_numbers<[1], [0], [0], [1], [0, 0, 1, 1], [], []>} : vector<16x128xbf16>, vector<128x128xbf16>, vector<16x128xf32> -> vector<16x128xf32>
    %6 = arith.truncf %5 : vector<16x128xf32> to vector<16x128xbf16>
    %c16 = arith.constant 16 : index
    %c0_8 = arith.constant 0 : index
    %7 = vector.load %arg6[%c16, %c0_8] : memref<48x128xbf16, #tpu.memory_space<vmem>>, vector<16x128xbf16>
    tpu.vector_store %arg6[%c16, %c0_8], %6 {strides = array<i32>} : memref<48x128xbf16, #tpu.memory_space<vmem>>, vector<16x128xbf16>,
    %c16_9 = arith.constant 16 : index
    %c0_10 = arith.constant 0 : index
    %8 = vector.load %arg6[%c16_9, %c0_10] : memref<48x128xbf16, #tpu.memory_space<vmem>>, vector<16x128xbf16>
    %cst_11 = arith.constant dense<0.000000e+00> : vector<16x128xf32>
    %9 = tpu.matmul %8, %3, %cst_11 {dimension_numbers = #tpu.dot_dimension_numbers<[1], [0], [0], [1], [0, 0, 1, 1], [], []>} : vector<16x128xbf16>, vector<128x128xbf16>, vector<16x128xf32> -> vector<16x128xf32>
    %10 = arith.truncf %9 : vector<16x128xf32> to vector<16x128xbf16>
    %c32 = arith.constant 32 : index
    %c0_12 = arith.constant 0 : index
    %11 = vector.load %arg6[%c32, %c0_12] : memref<48x128xbf16, #tpu.memory_space<vmem>>, vector<16x128xbf16>
    tpu.vector_store %arg6[%c32, %c0_12], %10 {strides = array<i32>} : memref<48x128xbf16, #tpu.memory_space<vmem>>, vector<16x128xbf16>,
    %c0_13 = arith.constant 0 : index
    %c0_14 = arith.constant 0 : index
    %12 = vector.load %arg3[%c0_13, %c0_14] : memref<24x48xbf16, #tpu.memory_space<vmem>>, vector<24x48xbf16>
    %c0_15 = arith.constant 0 : index
    %c0_16 = arith.constant 0 : index
    %13 = vector.load %arg6[%c0_15, %c0_16] : memref<48x128xbf16, #tpu.memory_space<vmem>>, vector<48x128xbf16>
    %cst_17 = arith.constant dense<0.000000e+00> : vector<24x128xf32>
    %14 = tpu.matmul %12, %13, %cst_17 {dimension_numbers = #tpu.dot_dimension_numbers<[1], [0], [0], [1], [0, 0, 1, 1], [], []>} : vector<24x48xbf16>, vector<48x128xbf16>, vector<24x128xf32> -> vector<24x128xf32>
    %c0_18 = arith.constant 0 : index
    %c0_19 = arith.constant 0 : index
    %15 = vector.load %arg4[%c0_18, %c0_19] : memref<24x1xf32, #tpu.memory_space<vmem>>, vector<24x1xf32>
    %16 = vector.broadcast %15 : vector<24x1xf32> to vector<24x128xf32>
    %17 = arith.addf %14, %16 : vector<24x128xf32>
    %c0_20 = arith.constant 0 : index
    %c0_21 = arith.constant 0 : index
    %18 = vector.load %arg5[%c0_20, %c0_21] : memref<24x128xf32, #tpu.memory_space<vmem>>, vector<24x128xf32>
    tpu.vector_store %arg5[%c0_20, %c0_21], %17 {strides = array<i32>} : memref<24x128xf32, #tpu.memory_space<vmem>>, vector<24x128xf32>,
    return
  }
  func.func @transform_0(%arg0: i32) -> (i32, i32) {
    %c0_i32 = arith.constant 0 : i32
    %c0_i32_0 = arith.constant 0 : i32
    return %arg0, %c0_i32 : i32, i32
  }
  func.func @transform_1(%arg0: i32) -> (i32, i32, i32) {
    %c0_i32 = arith.constant 0 : i32
    %c0_i32_0 = arith.constant 0 : i32
    %c0_i32_1 = arith.constant 0 : i32
    %c0_i32_2 = arith.constant 0 : i32
    return %c0_i32, %c0_i32_0, %c0_i32_1 : i32, i32, i32
  }
  func.func @transform_2(%arg0: i32) -> (i32, i32) {
    %c0_i32 = arith.constant 0 : i32
    %c0_i32_0 = arith.constant 0 : i32
    %c0_i32_1 = arith.constant 0 : i32
    return %c0_i32, %c0_i32_0 : i32, i32
  }
  func.func @transform_3(%arg0: i32) -> (i32, i32) {
    %c0_i32 = arith.constant 0 : i32
    %c0_i32_0 = arith.constant 0 : i32
    %c0_i32_1 = arith.constant 0 : i32
    return %c0_i32, %c0_i32_0 : i32, i32
  }
  func.func @transform_4(%arg0: i32) -> (i32, i32) {
    %c0_i32 = arith.constant 0 : i32
    %c0_i32_0 = arith.constant 0 : i32
    return %arg0, %c0_i32 : i32, i32
  }
}

</mosaic_0001>

<bundles_post_ra>
// kernel: graph_filter_forward.1
= control target key start
LH: loop header
LB: loop body
LE: loop exit
PB: predicated region body
PF: predicated region fallthrough
CT: control target
= control target key end

     0   :  { %s598_s15 = smov 0   ;;  %s658_s0 = inlined_call_operand.vmem [shape: bf16[32,128], index: 0, kind: input, shape index: {}]   ;;  %s659_s1 = inlined_call_operand.vmem [shape: bf16[1,128,128], index: 1, kind: input, shape index: {}]   ;;  %s660_s2 = inlined_call_operand.vmem [shape: bf16[24,48], index: 2, kind: input, shape index: {}]   ;;  %s661_s3 = inlined_call_operand.vmem [shape: f32[24,1], index: 3, kind: input, shape index: {}]   ;;  %s662_s4 = inlined_call_operand.vmem [shape: f32[48,128], index: 4, kind: output, shape index: {}]  }
   0x1 LB: > { %s459_s16 = sadd.s32 4294967295, %s570_s15   ;;  %p463_p0 = scmp.ge.s32.totalorder %s570_s15, 1  ;;  %s570_s15 = sphi %s598_s15, %s14_s15  }
   0x2   : > { %p163_p1 = scmp.lt.s32.totalorder %s570_s15, 3 }
   0x4   : > { %p164_p2 = pnand %p463_p0, %p163_p1 }
   0x5   : > { %s464_s19 = sshll.u32 (!%p164_p2), %s459_s16, 1  ;;  %s195_s24 = smul.u32 (!%p164_p2), 3, %s459_s16 }
   0x6   : > { %167 = sbr.rel (%p164_p2) target bundleno = 498 (0x1f2), region = 36  ;;  %p190_p3 = scmp.lt.s32.totalorder (!%p164_p2), %s464_s19, 3 }
   0x7   : > { %p196_p4 = scmp.lt.s32.totalorder (!%p164_p2), %s195_s24, 5 }
   0xb   : > { %v534_v0 = vld [vmem:[%s659_s1 + $0x38] sm:$0xff]  ;;  %v533_v1 = vld [vmem:[%s659_s1 + $0x30] sm:$0xff]  ;;  %s664_s19 = smov (!%p190_p3, %s464_s19), 3  ;;  %v532_v2 = vld [vmem:[%s659_s1 + $0x28] sm:$0xff]  ;;  %v572_v15 = vmov 0   ;;  %vm375_vm0 = vcmask 392192  }
   0xc   : > { %278 = vmatpush.bf16.msra.mxu0 %v534_v0  ;;  %304 = vmatpush.bf16.msra.mxu1 %v534_v0  ;;  %s465_s22 = sshll.u32 %s664_s19, 2  ;;  %v531_v4 = vld [vmem:[%s659_s1 + $0x20] sm:$0xff]  ;;  %v530_v5 = vld [vmem:[%s659_s1 + $0x18] sm:$0xff]  ;;  %v529_v6 = vld [vmem:[%s659_s1 + $0x10] sm:$0xff]  ;;  %s666_s24 = smov (!%p196_p4, %s195_s24), 5 }
   0xd   : > { %s193_s27 = scalar_lea.vmem %s658_s0, %s465_s22  ;;  %v528_v7 = vld [vmem:[%s659_s1 + $0x8] sm:$0xff]  ;;  %v527_v8 = vld [vmem:[%s659_s1] sm:$0xff]  ;;  %562 = vset.pattern.permute.xlu0 %v572_v15  ;;  %563 = vset.pattern.permute.xlu1 %v572_v15  ;;  %v333_v19 = vld [vmem:[%s661_s3 + $0x10] sm:$0xff]  ;;  %s466_s25 = sshll.u32 %s666_s24, 3 }
   0xe   : > { %v202_v3 = vld [vmem:[%s193_s27] sm:$0xff]   ;;  %346 = vperm.xlu1 %563, %v333_v19   ;;  %v332_v21 = vld [vmem:[%s661_s3 + $0x8] sm:$0xff]  ;;  %s199_s28 = scalar_lea.vmem %s662_s4, %s466_s25 }
   0xf   : > { %204 = vst [vmem:[#allocation2] sm:$0xff] %v202_v3   ;;  %v331_v18 = vld [vmem:[%s661_s3] sm:$0xff]  ;;  %v324_v25 = vld [vmem:[%s660_s2 + $0x8] sm:$0xf] }
  0x10   : > { %279 = vmatpush.bf16.msra.mxu0 %v533_v1  ;;  %305 = vmatpush.bf16.msra.mxu1 %v533_v1  ;;  %v537_v24 = vld [vmem:[%s660_s2] sm:$0xff]  ;;  %v354_v26 = vunpack.c.l.b16 %v324_v25 }
  0x11   : > { %336 = vperm.xlu0 %562, %v331_v18  }
  0x12   : > { %v356_v27 = vpack.c.b16 %v354_v26, %v354_v26 }
  0x14   : > { %280 = vmatpush.bf16.msra.mxu0 %v532_v2  ;;  %306 = vmatpush.bf16.msra.mxu1 %v532_v2 }
  0x16   : > { %v535_v9 = vld [vmem:[#allocation2] sm:$0xff] }
  0x17   : > { %v538_v23 = vld [vmem:[#allocation2] sm:$0xff] }
  0x18   : > { %281 = vmatpush.bf16.msra.mxu0 %v531_v4  ;;  %307 = vmatpush.bf16.msra.mxu1 %v531_v4 }
  0x19   : > { %341 = vperm.xlu0 %562, %v332_v21  }
  0x1c   : > { %282 = vmatpush.bf16.msra.mxu0 %v530_v5  ;;  %308 = vmatpush.bf16.msra.mxu1 %v530_v5 }
  0x20   : > { %283 = vmatpush.bf16.msra.mxu0 %v529_v6  ;;  %309 = vmatpush.bf16.msra.mxu1 %v529_v6 }
  0x24   : > { %284 = vmatpush.bf16.msra.mxu0 %v528_v7  ;;  %310 = vmatpush.bf16.msra.mxu1 %v528_v7 }
  0x28   : > { %285 = vmatpush.bf16.msra.mxu0 %v527_v8  ;;  %311 = vmatpush.bf16.msra.mxu1 %v527_v8 }
  0x2b   : > { %286 = vmatmul.bf16.vlgmr.msra.gmra.mxu0 %v535_v9 }
  0x80   : > { %v347_v34 = vpop.permute.xlu1 %346 }
  0x83   : > { %v337_v28 = vpop.permute.xlu0 %336 }
  0x8b   : > { %v342_v31 = vpop.permute.xlu0 %341 }
  0xa8   : > { %v287_v10 = vpop.f32.mrf.mxu0 }
  0xb0   : > { %v289_v11 = vpop.f32.mrf.mxu0 }
  0xb1   : > { %v544_v12 = vpack.c.bf16 %v289_v11, %v287_v10 }
  0xb3   : > { %551 = vst [vmem:[#allocation2 + $0x8] sm:$0xff] %v544_v12  }
  0xba   : > { %v536_v13 = vld [vmem:[#allocation2 + $0x8] sm:$0xff] }
  0xbb   : > { %312 = vmatmul.bf16.vlgmr.msra.gmra.mxu1 %v536_v13  ;;  %v539_v22 = vld [vmem:[#allocation2 + $0x8] sm:$0xff] }
 0x138   : > { %v313_v14 = vpop.f32.mrf.mxu1 }
 0x140   : > { %v315_v16 = vpop.f32.mrf.mxu1 }
 0x141   : > { %v549_v17 = vpack.c.bf16 %v315_v16, %v313_v14 }
 0x143   : > { %552 = vst [vmem:[#allocation2 + $0x10] sm:$0xff] %v549_v17  }
 0x14a   : > { %v540_v20 = vld [vmem:[#allocation2 + $0x10] sm:$0xff] }
 0x14b   : > { %387 = vmatpush.bf16.msra.mxu2 %v540_v20 }
 0x14f   : > { %388 = vmatpush.bf16.msra.mxu2 %v539_v22 }
 0x153   : > { %389 = vmatpush.bf16.msra.mxu2 %v538_v23 }
 0x156   : > { %523 = vmatmul.msk.bf16.vlgmr.msra.gmra.mxu2 %vm375_vm0, %v537_v24 }
 0x166   : > { %524 = vmatmul.msk.bf16.gmra.mxu2 %vm375_vm0, %v356_v27 }
 0x1d9   : > { %v391_v29 = vpop.f32.mrf.mxu2 }
 0x1da   : > { %v392_v30 = vadd.f32 %v391_v29, %v337_v28 }
 0x1dc   : > { %400 = vst [vmem:[%s199_s28] sm:$0xff] %v392_v30 }
 0x1e1   : > { %v393_v32 = vpop.f32.mrf.mxu2 }
 0x1e2   : > { %v394_v33 = vadd.f32 %v393_v32, %v342_v31 }
 0x1e4   : > { %401 = vst [vmem:[%s199_s28 + $0x8] sm:$0xff] %v394_v33 }
 0x1e9   : > { %v396_v35 = vpop.f32.mrf.mxu2 }
 0x1ea   : > { %v397_v36 = vadd.f32 %v396_v35, %v347_v34 }
 0x1ec   : > { %402 = vst [vmem:[%s199_s28 + $0x10] sm:$0xff] %v397_v36 }
 0x1f1   : > { %v398_v37 = vpop.f32.mrf.mxu2 }
 0x1f2 PF: > { %s14_s15 = sadd.s32 1, %s570_s15  }
 0x1f3   : > { %p11_p5 = scmp.ge.s32.totalorder %s14_s15, 4  }
 0x1f5   :  { %13 = sbr.rel (!%p11_p5) target bundleno = 1 (0x1), region = 66 }

// kernel: graph_filter_forward.1
= control target key start
LH: loop header
LB: loop body
LE: loop exit
PB: predicated region body
PF: predicated region fallthrough
CT: control target
= control target key end

     0   :  { %s598_s15 = smov 0   ;;  %s658_s0 = inlined_call_operand.vmem [shape: bf16[32,128], index: 0, kind: input, shape index: {}]   ;;  %s659_s1 = inlined_call_operand.vmem [shape: bf16[1,128,128], index: 1, kind: input, shape index: {}]   ;;  %s660_s2 = inlined_call_operand.vmem [shape: bf16[24,48], index: 2, kind: input, shape index: {}]   ;;  %s661_s3 = inlined_call_operand.vmem [shape: f32[24,1], index: 3, kind: input, shape index: {}]   ;;  %s662_s4 = inlined_call_operand.vmem [shape: f32[48,128], index: 4, kind: output, shape index: {}]  }
   0x1 LB: > { %s459_s16 = sadd.s32 4294967295, %s570_s15   ;;  %p463_p0 = scmp.ge.s32.totalorder %s570_s15, 1  ;;  %s570_s15 = sphi %s598_s15, %s14_s15  }
   0x2   : > { %p163_p1 = scmp.lt.s32.totalorder %s570_s15, 3 }
   0x4   : > { %p164_p2 = pnand %p463_p0, %p163_p1 }
   0x5   : > { %s464_s19 = sshll.u32 (!%p164_p2), %s459_s16, 1  ;;  %s195_s24 = smul.u32 (!%p164_p2), 3, %s459_s16 }
   0x6   : > { %167 = sbr.rel (%p164_p2) target bundleno = 498 (0x1f2), region = 36  ;;  %p190_p3 = scmp.lt.s32.totalorder (!%p164_p2), %s464_s19, 3 }
   0x7   : > { %p196_p4 = scmp.lt.s32.totalorder (!%p164_p2), %s195_s24, 5 }
   0xb   : > { %v534_v0 = vld [vmem:[%s659_s1 + $0x38] sm:$0xff]  ;;  %v533_v1 = vld [vmem:[%s659_s1 + $0x30] sm:$0xff]  ;;  %s664_s19 = smov (!%p190_p3, %s464_s19), 3  ;;  %v532_v2 = vld [vmem:[%s659_s1 + $0x28] sm:$0xff]  ;;  %v572_v15 = vmov 0   ;;  %vm375_vm0 = vcmask 392192  }
   0xc   : > { %278 = vmatpush.bf16.msra.mxu0 %v534_v0  ;;  %304 = vmatpush.bf16.msra.mxu1 %v534_v0  ;;  %s465_s22 = sshll.u32 %s664_s19, 2  ;;  %v531_v4 = vld [vmem:[%s659_s1 + $0x20] sm:$0xff]  ;;  %v530_v5 = vld [vmem:[%s659_s1 + $0x18] sm:$0xff]  ;;  %v529_v6 = vld [vmem:[%s659_s1 + $0x10] sm:$0xff]  ;;  %s666_s24 = smov (!%p196_p4, %s195_s24), 5 }
   0xd   : > { %s193_s27 = scalar_lea.vmem %s658_s0, %s465_s22  ;;  %v528_v7 = vld [vmem:[%s659_s1 + $0x8] sm:$0xff]  ;;  %v527_v8 = vld [vmem:[%s659_s1] sm:$0xff]  ;;  %562 = vset.pattern.permute.xlu0 %v572_v15  ;;  %563 = vset.pattern.permute.xlu1 %v572_v15  ;;  %v333_v19 = vld [vmem:[%s661_s3 + $0x10] sm:$0xff]  ;;  %s466_s25 = sshll.u32 %s666_s24, 3 }
   0xe   : > { %v202_v3 = vld [vmem:[%s193_s27] sm:$0xff]   ;;  %346 = vperm.xlu1 %563, %v333_v19   ;;  %v332_v21 = vld [vmem:[%s661_s3 + $0x8] sm:$0xff]  ;;  %s199_s28 = scalar_lea.vmem %s662_s4, %s466_s25 }
   0xf   : > { %204 = vst [vmem:[#allocation2] sm:$0xff] %v202_v3   ;;  %v331_v18 = vld [vmem:[%s661_s3] sm:$0xff]  ;;  %v324_v25 = vld [vmem:[%s660_s2 + $0x8] sm:$0xf] }
  0x10   : > { %279 = vmatpush.bf16.msra.mxu0 %v533_v1  ;;  %305 = vmatpush.bf16.msra.mxu1 %v533_v1  ;;  %v537_v24 = vld [vmem:[%s660_s2] sm:$0xff]  ;;  %v354_v26 = vunpack.c.l.b16 %v324_v25 }
  0x11   : > { %336 = vperm.xlu0 %562, %v331_v18  }
  0x12   : > { %v356_v27 = vpack.c.b16 %v354_v26, %v354_v26 }
  0x14   : > { %280 = vmatpush.bf16.msra.mxu0 %v532_v2  ;;  %306 = vmatpush.bf16.msra.mxu1 %v532_v2 }
  0x16   : > { %v535_v9 = vld [vmem:[#allocation2] sm:$0xff] }
  0x17   : > { %v538_v23 = vld [vmem:[#allocation2] sm:$0xff] }
  0x18   : > { %281 = vmatpush.bf16.msra.mxu0 %v531_v4  ;;  %307 = vmatpush.bf16.msra.mxu1 %v531_v4 }
  0x19   : > { %341 = vperm.xlu0 %562, %v332_v21  }
  0x1c   : > { %282 = vmatpush.bf16.msra.mxu0 %v530_v5  ;;  %308 = vmatpush.bf16.msra.mxu1 %v530_v5 }
  0x20   : > { %283 = vmatpush.bf16.msra.mxu0 %v529_v6  ;;  %309 = vmatpush.bf16.msra.mxu1 %v529_v6 }
  0x24   : > { %284 = vmatpush.bf16.msra.mxu0 %v528_v7  ;;  %310 = vmatpush.bf16.msra.mxu1 %v528_v7 }
  0x28   : > { %285 = vmatpush.bf16.msra.mxu0 %v527_v8  ;;  %311 = vmatpush.bf16.msra.mxu1 %v527_v8 }
  0x2b   : > { %286 = vmatmul.bf16.vlgmr.msra.gmra.mxu0 %v535_v9 }
  0x80   : > { %v347_v34 = vpop.permute.xlu1 %346 }
  0x83   : > { %v337_v28 = vpop.permute.xlu0 %336 }
  0x8b   : > { %v342_v31 = vpop.permute.xlu0 %341 }
  0xa8   : > { %v287_v10 = vpop.f32.mrf.mxu0 }
  0xb0   : > { %v289_v11 = vpop.f32.mrf.mxu0 }
  0xb1   : > { %v544_v12 = vpack.c.bf16 %v289_v11, %v287_v10 }
  0xb3   : > { %551 = vst [vmem:[#allocation2 + $0x8] sm:$0xff] %v544_v12  }
  0xba   : > { %v536_v13 = vld [vmem:[#allocation2 + $0x8] sm:$0xff] }
  0xbb   : > { %312 = vmatmul.bf16.vlgmr.msra.gmra.mxu1 %v536_v13  ;;  %v539_v22 = vld [vmem:[#allocation2 + $0x8] sm:$0xff] }
 0x138   : > { %v313_v14 = vpop.f32.mrf.mxu1 }
 0x140   : > { %v315_v16 = vpop.f32.mrf.mxu1 }
 0x141   : > { %v549_v17 = vpack.c.bf16 %v315_v16, %v313_v14 }
 0x143   : > { %552 = vst [vmem:[#allocation2 + $0x10] sm:$0xff] %v549_v17  }
 0x14a   : > { %v540_v20 = vld [vmem:[#allocation2 + $0x10] sm:$0xff] }
 0x14b   : > { %387 = vmatpush.bf16.msra.mxu2 %v540_v20 }
 0x14f   : > { %388 = vmatpush.bf16.msra.mxu2 %v539_v22 }
 0x153   : > { %389 = vmatpush.bf16.msra.mxu2 %v538_v23 }
 0x156   : > { %523 = vmatmul.msk.bf16.vlgmr.msra.gmra.mxu2 %vm375_vm0, %v537_v24 }
 0x166   : > { %524 = vmatmul.msk.bf16.gmra.mxu2 %vm375_vm0, %v356_v27 }
 0x1d9   : > { %v391_v29 = vpop.f32.mrf.mxu2 }
 0x1da   : > { %v392_v30 = vadd.f32 %v391_v29, %v337_v28 }
 0x1dc   : > { %400 = vst [vmem:[%s199_s28] sm:$0xff] %v392_v30 }
 0x1e1   : > { %v393_v32 = vpop.f32.mrf.mxu2 }
 0x1e2   : > { %v394_v33 = vadd.f32 %v393_v32, %v342_v31 }
 0x1e4   : > { %401 = vst [vmem:[%s199_s28 + $0x8] sm:$0xff] %v394_v33 }
 0x1e9   : > { %v396_v35 = vpop.f32.mrf.mxu2 }
 0x1ea   : > { %v397_v36 = vadd.f32 %v396_v35, %v347_v34 }
 0x1ec   : > { %402 = vst [vmem:[%s199_s28 + $0x10] sm:$0xff] %v397_v36 }
 0x1f1   : > { %v398_v37 = vpop.f32.mrf.mxu2 }
 0x1f2 PF: > { %s14_s15 = sadd.s32 1, %s570_s15  }
 0x1f3   : > { %p11_p5 = scmp.ge.s32.totalorder %s14_s15, 4  }
 0x1f5   :  { %13 = sbr.rel (!%p11_p5) target bundleno = 1 (0x1), region = 66 }

</bundles_post_ra>
